<compile_context>
chip_gen: v5e
topology: v5e:2x2
jax: 0.10.0
libtpu: 0.0.40
codegen_flags: <defaults>
</compile_context>

<pallas_src>
import jax
import jax.numpy as jnp
from jax import lax
from jax.experimental import pallas as pl
from jax.experimental.pallas import tpu as pltpu

HIDDEN = 256
OUT = 1
OUT_PAD_ROWS = 8  # final-layer output rows, padded 1 -> 8 sublanes


def _round_up(x, m):
    return (x + m - 1) // m * m


def _cdiv(a, b):
    return -(-a // b)


def _critic5l_kernel(x_ref, w1_ref, b1_ref, w2_ref, b2_ref, w3_ref, b3_ref,
                     w4_ref, b4_ref, w5_ref, b5_ref, w6_ref, b6_ref, o_ref):
    """Fused 6-layer MLP.

    x: (tb, in_dim) bf16; Wk: (in, out) bf16; bk: (1, out) f32.
    Final layer uses W6 padded to (8, 256) and an NT matmul so the output is a
    lane-dense (8, tb) slab (batch along lanes); b6 is (8, 1) f32.
    """
    # Layer 1 (input_size -> 256), f32 accumulation.
    h = jnp.dot(x_ref[...], w1_ref[...], preferred_element_type=jnp.float32)
    h = jnp.maximum(h + b1_ref[...], 0.0)

    # Layers 2..5 (256 -> 256).
    for w_ref, b_ref in ((w2_ref, b2_ref), (w3_ref, b3_ref),
                         (w4_ref, b4_ref), (w5_ref, b5_ref)):
        h = jnp.dot(h.astype(jnp.bfloat16), w_ref[...],
                    preferred_element_type=jnp.float32)
        h = jnp.maximum(h + b_ref[...], 0.0)

    # Layer 6 (256 -> 1), transposed: (8, 256) x (tb, 256)^T -> (8, tb).
    out_t = lax.dot_general(
        w6_ref[...], h.astype(jnp.bfloat16),
        dimension_numbers=(((1,), (1,)), ((), ())),
        preferred_element_type=jnp.float32)
    o_ref[...] = out_t + b6_ref[...]


def critic5l_forward(s, params, a=None, *, max_batch_tile=1024):
    """params: list of (W_t [in, out] f32, b [1, out] f32) for the 6 Linear layers."""
    B = s.shape[0]

    # --- inputs: concat + bf16 cast once in the wrapper (no in-kernel split-K) ---
    x = s if a is None else jnp.concatenate([s, a], axis=1)
    x = x.astype(jnp.bfloat16)
    in_dim = x.shape[1]

    # --- weights: bf16, biases f32; pad the 1-row final layer to 8 sublanes ---
    prepared = []
    for w_t, b in params[:-1]:
        prepared += [w_t.astype(jnp.bfloat16), b.astype(jnp.float32)]
    w6_t, b6 = params[-1]  # (256, 1), (1, 1)
    w6p = jnp.zeros((OUT_PAD_ROWS, HIDDEN), jnp.bfloat16).at[0, :].set(
        w6_t[:, 0].astype(jnp.bfloat16))
    b6p = jnp.zeros((OUT_PAD_ROWS, 1), jnp.float32).at[0, 0].set(
        b6.astype(jnp.float32)[0, 0])
    prepared += [w6p, b6p]

    # --- batch tiling ---
    # <=128 rows: single tile (launch-dominated regime anyway).
    # >128 rows: 128-aligned tiles (lane-dense transposed output store), >=2 grid
    # steps so both v7x TensorCores are used, tile capped at max_batch_tile.
    mbt = max(128, (max_batch_tile // 128) * 128)
    b8 = _round_up(B, 8)
    if b8 <= 128:
        tb = b8
    else:
        n_steps = max(2, _cdiv(b8, mbt))
        tb = min(mbt, _round_up(_cdiv(b8, n_steps), 128))
    b_pad = _round_up(b8, tb)
    if b_pad != B:
        x = jnp.pad(x, ((0, b_pad - B), (0, 0)))
    grid = (b_pad // tb,)

    in_specs = [pl.BlockSpec((tb, in_dim), lambda i: (i, 0))]
    # Constant block index -> DMA'd once, stays VMEM-resident across grid steps.
    in_specs += [pl.BlockSpec(w.shape, lambda i: (0, 0)) for w in prepared]
    out_spec = pl.BlockSpec((OUT_PAD_ROWS, tb), lambda i: (0, i))

    flops = 2 * b_pad * (in_dim * HIDDEN + 4 * HIDDEN * HIDDEN
                         + HIDDEN * OUT_PAD_ROWS)
    bytes_accessed = (x.size * x.dtype.itemsize
                      + sum(int(w.size) * w.dtype.itemsize for w in prepared)
                      + OUT_PAD_ROWS * b_pad * 4)
    cost = pl.CostEstimate(flops=int(flops), transcendentals=0,
                           bytes_accessed=int(bytes_accessed))

    out = pl.pallas_call(
        _critic5l_kernel,
        out_shape=jax.ShapeDtypeStruct((OUT_PAD_ROWS, b_pad), jnp.float32),
        grid=grid,
        in_specs=in_specs,
        out_specs=out_spec,
        compiler_params=pltpu.CompilerParams(
            dimension_semantics=("parallel",)),
        cost_estimate=cost,
    )(x, *prepared)

    # Row 0 of the transposed output holds the real values; rows 1..7 are padding.
    return out[0, :B][:, None]


def init_params(key, input_size):
    """PyTorch-Linear-equivalent init, stored as (W_t [in, out] f32, b [1, out] f32)."""
    sizes = [(input_size, HIDDEN)] + [(HIDDEN, HIDDEN)] * 4 + [(HIDDEN, OUT)]
    params = []
    for fan_in, fan_out in sizes:
        key, kw, kb = jax.random.split(key, 3)
        bound = 1.0 / jnp.sqrt(fan_in)
        w_t = jax.random.uniform(kw, (fan_in, fan_out), jnp.float32, -bound, bound)
        b = jax.random.uniform(kb, (1, fan_out), jnp.float32, -bound, bound)
        params.append((w_t, b))
    return params


def reference_forward(s, params, a=None):
    """Pure-JAX reference mirroring the kernel's dtype handling (bf16 in, f32 acc)."""
    x = s if a is None else jnp.concatenate([s, a], axis=1)
    x = x.astype(jnp.bfloat16)
    for i, (w_t, b) in enumerate(params):
        x = jnp.dot(x, w_t.astype(jnp.bfloat16),
                    preferred_element_type=jnp.float32) + b
        if i < len(params) - 1:
            x = jnp.maximum(x, 0.0).astype(jnp.bfloat16)
    return x


if __name__ == "__main__":
    key = jax.random.PRNGKey(0)
    k_s, k_a, k_p, k_p2, k_s2, k_a2, k_s3 = jax.random.split(key, 7)

    obs_dim = 24  # observation_space
    act_dim = 8   # action_space.shape[0]
    params = init_params(k_p, obs_dim + act_dim)

    # Small-batch case (single 8-row tile, grid=(1,)).
    batch = 8
    s = jax.random.normal(k_s, (batch, obs_dim), jnp.float32)
    a = jax.random.normal(k_a, (batch, act_dim), jnp.float32)
    out = jax.block_until_ready(critic5l_forward(s, params, a))
    ref = reference_forward(s, params, a)
    assert out.shape == (batch, 1), out.shape
    assert jnp.allclose(out, ref, atol=2e-3, rtol=2e-3), (out, ref)

    # Larger, non-multiple batch to exercise multi-step tiling (tb=256, grid=(2,)).
    batch2 = 300
    s2 = jax.random.normal(k_s2, (batch2, obs_dim), jnp.float32)
    a2 = jax.random.normal(k_a2, (batch2, act_dim), jnp.float32)
    out2 = jax.block_until_ready(critic5l_forward(s2, params, a2))
    ref2 = reference_forward(s2, params, a2)
    assert out2.shape == (batch2, 1), out2.shape
    assert jnp.allclose(out2, ref2, atol=2e-3, rtol=2e-3), (out2, ref2)

    # No-action path (a=None) with a batch that is not a multiple of 8.
    params_noact = init_params(k_p2, obs_dim)
    batch3 = 5
    s3 = jax.random.normal(k_s3, (batch3, obs_dim), jnp.float32)
    out3 = jax.block_until_ready(critic5l_forward(s3, params_noact))
    ref3 = reference_forward(s3, params_noact)
    assert out3.shape == (batch3, 1), out3.shape
    assert jnp.allclose(out3, ref3, atol=2e-3, rtol=2e-3), (out3, ref3)

    print("KERNEL_OK")
</pallas_src>

<mosaic_0001>
module attributes {stable_mosaic.version = 11 : i64} {
  func.func @_critic5l_kernel(%arg0: i32, %arg1: memref<8x32xbf16, #tpu.memory_space<vmem>>, %arg2: memref<32x256xbf16, #tpu.memory_space<vmem>>, %arg3: memref<1x256xf32, #tpu.memory_space<vmem>>, %arg4: memref<256x256xbf16, #tpu.memory_space<vmem>>, %arg5: memref<1x256xf32, #tpu.memory_space<vmem>>, %arg6: memref<256x256xbf16, #tpu.memory_space<vmem>>, %arg7: memref<1x256xf32, #tpu.memory_space<vmem>>, %arg8: memref<256x256xbf16, #tpu.memory_space<vmem>>, %arg9: memref<1x256xf32, #tpu.memory_space<vmem>>, %arg10: memref<256x256xbf16, #tpu.memory_space<vmem>>, %arg11: memref<1x256xf32, #tpu.memory_space<vmem>>, %arg12: memref<8x256xbf16, #tpu.memory_space<vmem>>, %arg13: memref<8x1xf32, #tpu.memory_space<vmem>>, %arg14: memref<8x8xf32, #tpu.memory_space<vmem>>) attributes {dimension_semantics = [#tpu.dimension_semantics<parallel>], iteration_bounds = array<i64: 1>, scalar_prefetch = 0 : i64, scratch_operands = 0 : i64, tpu.core_type = #tpu.core_type<tc>, window_params = [{transform_indices = @transform_0, window_bounds = array<i64: 8, 32>}, {pipeline_mode = #tpu.pipeline_mode<synchronous>, transform_indices = @transform_1, window_bounds = array<i64: 32, 256>}, {pipeline_mode = #tpu.pipeline_mode<synchronous>, transform_indices = @transform_2, window_bounds = array<i64: 1, 256>}, {pipeline_mode = #tpu.pipeline_mode<synchronous>, transform_indices = @transform_3, window_bounds = array<i64: 256, 256>}, {pipeline_mode = #tpu.pipeline_mode<synchronous>, transform_indices = @transform_4, window_bounds = array<i64: 1, 256>}, {pipeline_mode = #tpu.pipeline_mode<synchronous>, transform_indices = @transform_5, window_bounds = array<i64: 256, 256>}, {pipeline_mode = #tpu.pipeline_mode<synchronous>, transform_indices = @transform_6, window_bounds = array<i64: 1, 256>}, {pipeline_mode = #tpu.pipeline_mode<synchronous>, transform_indices = @transform_7, window_bounds = array<i64: 256, 256>}, {pipeline_mode = #tpu.pipeline_mode<synchronous>, transform_indices = @transform_8, window_bounds = array<i64: 1, 256>}, {pipeline_mode = #tpu.pipeline_mode<synchronous>, transform_indices = @transform_9, window_bounds = array<i64: 256, 256>}, {pipeline_mode = #tpu.pipeline_mode<synchronous>, transform_indices = @transform_10, window_bounds = array<i64: 1, 256>}, {pipeline_mode = #tpu.pipeline_mode<synchronous>, transform_indices = @transform_11, window_bounds = array<i64: 8, 256>}, {pipeline_mode = #tpu.pipeline_mode<synchronous>, transform_indices = @transform_12, window_bounds = array<i64: 8, 1>}, {transform_indices = @transform_13, window_bounds = array<i64: 8, 8>}]} {
    %c0 = arith.constant 0 : index
    %c0_0 = arith.constant 0 : index
    %0 = vector.load %arg1[%c0, %c0_0] : memref<8x32xbf16, #tpu.memory_space<vmem>>, vector<8x32xbf16>
    %c0_1 = arith.constant 0 : index
    %c0_2 = arith.constant 0 : index
    %1 = vector.load %arg2[%c0_1, %c0_2] : memref<32x256xbf16, #tpu.memory_space<vmem>>, vector<32x256xbf16>
    %cst = arith.constant dense<0.000000e+00> : vector<8x256xf32>
    %2 = tpu.matmul %0, %1, %cst {dimension_numbers = #tpu.dot_dimension_numbers<[1], [0], [0], [1], [0, 0, 1, 1], [], []>} : vector<8x32xbf16>, vector<32x256xbf16>, vector<8x256xf32> -> vector<8x256xf32>
    %c0_3 = arith.constant 0 : index
    %c0_4 = arith.constant 0 : index
    %3 = vector.load %arg3[%c0_3, %c0_4] : memref<1x256xf32, #tpu.memory_space<vmem>>, vector<1x256xf32>
    %4 = vector.broadcast %3 : vector<1x256xf32> to vector<8x256xf32>
    %5 = arith.addf %2, %4 : vector<8x256xf32>
    %cst_5 = arith.constant 0.000000e+00 : f32
    %6 = vector.broadcast %cst_5 : f32 to vector<8x256xf32>
    %7 = arith.maximumf %5, %6 : vector<8x256xf32>
    %8 = arith.truncf %7 : vector<8x256xf32> to vector<8x256xbf16>
    %c0_6 = arith.constant 0 : index
    %c0_7 = arith.constant 0 : index
    %9 = vector.load %arg4[%c0_6, %c0_7] : memref<256x256xbf16, #tpu.memory_space<vmem>>, vector<256x256xbf16>
    %cst_8 = arith.constant dense<0.000000e+00> : vector<8x256xf32>
    %10 = tpu.matmul %8, %9, %cst_8 {dimension_numbers = #tpu.dot_dimension_numbers<[1], [0], [0], [1], [0, 0, 1, 1], [], []>} : vector<8x256xbf16>, vector<256x256xbf16>, vector<8x256xf32> -> vector<8x256xf32>
    %c0_9 = arith.constant 0 : index
    %c0_10 = arith.constant 0 : index
    %11 = vector.load %arg5[%c0_9, %c0_10] : memref<1x256xf32, #tpu.memory_space<vmem>>, vector<1x256xf32>
    %12 = vector.broadcast %11 : vector<1x256xf32> to vector<8x256xf32>
    %13 = arith.addf %10, %12 : vector<8x256xf32>
    %cst_11 = arith.constant 0.000000e+00 : f32
    %14 = vector.broadcast %cst_11 : f32 to vector<8x256xf32>
    %15 = arith.maximumf %13, %14 : vector<8x256xf32>
    %16 = arith.truncf %15 : vector<8x256xf32> to vector<8x256xbf16>
    %c0_12 = arith.constant 0 : index
    %c0_13 = arith.constant 0 : index
    %17 = vector.load %arg6[%c0_12, %c0_13] : memref<256x256xbf16, #tpu.memory_space<vmem>>, vector<256x256xbf16>
    %cst_14 = arith.constant dense<0.000000e+00> : vector<8x256xf32>
    %18 = tpu.matmul %16, %17, %cst_14 {dimension_numbers = #tpu.dot_dimension_numbers<[1], [0], [0], [1], [0, 0, 1, 1], [], []>} : vector<8x256xbf16>, vector<256x256xbf16>, vector<8x256xf32> -> vector<8x256xf32>
    %c0_15 = arith.constant 0 : index
    %c0_16 = arith.constant 0 : index
    %19 = vector.load %arg7[%c0_15, %c0_16] : memref<1x256xf32, #tpu.memory_space<vmem>>, vector<1x256xf32>
    %20 = vector.broadcast %19 : vector<1x256xf32> to vector<8x256xf32>
    %21 = arith.addf %18, %20 : vector<8x256xf32>
    %cst_17 = arith.constant 0.000000e+00 : f32
    %22 = vector.broadcast %cst_17 : f32 to vector<8x256xf32>
    %23 = arith.maximumf %21, %22 : vector<8x256xf32>
    %24 = arith.truncf %23 : vector<8x256xf32> to vector<8x256xbf16>
    %c0_18 = arith.constant 0 : index
    %c0_19 = arith.constant 0 : index
    %25 = vector.load %arg8[%c0_18, %c0_19] : memref<256x256xbf16, #tpu.memory_space<vmem>>, vector<256x256xbf16>
    %cst_20 = arith.constant dense<0.000000e+00> : vector<8x256xf32>
    %26 = tpu.matmul %24, %25, %cst_20 {dimension_numbers = #tpu.dot_dimension_numbers<[1], [0], [0], [1], [0, 0, 1, 1], [], []>} : vector<8x256xbf16>, vector<256x256xbf16>, vector<8x256xf32> -> vector<8x256xf32>
    %c0_21 = arith.constant 0 : index
    %c0_22 = arith.constant 0 : index
    %27 = vector.load %arg9[%c0_21, %c0_22] : memref<1x256xf32, #tpu.memory_space<vmem>>, vector<1x256xf32>
    %28 = vector.broadcast %27 : vector<1x256xf32> to vector<8x256xf32>
    %29 = arith.addf %26, %28 : vector<8x256xf32>
    %cst_23 = arith.constant 0.000000e+00 : f32
    %30 = vector.broadcast %cst_23 : f32 to vector<8x256xf32>
    %31 = arith.maximumf %29, %30 : vector<8x256xf32>
    %32 = arith.truncf %31 : vector<8x256xf32> to vector<8x256xbf16>
    %c0_24 = arith.constant 0 : index
    %c0_25 = arith.constant 0 : index
    %33 = vector.load %arg10[%c0_24, %c0_25] : memref<256x256xbf16, #tpu.memory_space<vmem>>, vector<256x256xbf16>
    %cst_26 = arith.constant dense<0.000000e+00> : vector<8x256xf32>
    %34 = tpu.matmul %32, %33, %cst_26 {dimension_numbers = #tpu.dot_dimension_numbers<[1], [0], [0], [1], [0, 0, 1, 1], [], []>} : vector<8x256xbf16>, vector<256x256xbf16>, vector<8x256xf32> -> vector<8x256xf32>
    %c0_27 = arith.constant 0 : index
    %c0_28 = arith.constant 0 : index
    %35 = vector.load %arg11[%c0_27, %c0_28] : memref<1x256xf32, #tpu.memory_space<vmem>>, vector<1x256xf32>
    %36 = vector.broadcast %35 : vector<1x256xf32> to vector<8x256xf32>
    %37 = arith.addf %34, %36 : vector<8x256xf32>
    %cst_29 = arith.constant 0.000000e+00 : f32
    %38 = vector.broadcast %cst_29 : f32 to vector<8x256xf32>
    %39 = arith.maximumf %37, %38 : vector<8x256xf32>
    %c0_30 = arith.constant 0 : index
    %c0_31 = arith.constant 0 : index
    %40 = vector.load %arg12[%c0_30, %c0_31] : memref<8x256xbf16, #tpu.memory_space<vmem>>, vector<8x256xbf16>
    %41 = arith.truncf %39 : vector<8x256xf32> to vector<8x256xbf16>
    %cst_32 = arith.constant dense<0.000000e+00> : vector<8x8xf32>
    %42 = tpu.matmul %40, %41, %cst_32 {dimension_numbers = #tpu.dot_dimension_numbers<[1], [1], [0], [0], [0, 0, 1, 0], [], []>} : vector<8x256xbf16>, vector<8x256xbf16>, vector<8x8xf32> -> vector<8x8xf32>
    %c0_33 = arith.constant 0 : index
    %c0_34 = arith.constant 0 : index
    %43 = vector.load %arg13[%c0_33, %c0_34] : memref<8x1xf32, #tpu.memory_space<vmem>>, vector<8x1xf32>
    %44 = vector.broadcast %43 : vector<8x1xf32> to vector<8x8xf32>
    %45 = arith.addf %42, %44 : vector<8x8xf32>
    %c0_35 = arith.constant 0 : index
    %c0_36 = arith.constant 0 : index
    %46 = vector.load %arg14[%c0_35, %c0_36] : memref<8x8xf32, #tpu.memory_space<vmem>>, vector<8x8xf32>
    tpu.vector_store %arg14[%c0_35, %c0_36], %45 {strides = array<i32>} : memref<8x8xf32, #tpu.memory_space<vmem>>, vector<8x8xf32>,
    return
  }
  func.func @transform_0(%arg0: i32) -> (i32, i32) {
    %c0_i32 = arith.constant 0 : i32
    %c0_i32_0 = arith.constant 0 : i32
    return %arg0, %c0_i32 : i32, i32
  }
  func.func @transform_1(%arg0: i32) -> (i32, i32) {
    %c0_i32 = arith.constant 0 : i32
    %c0_i32_0 = arith.constant 0 : i32
    %c0_i32_1 = arith.constant 0 : i32
    return %c0_i32, %c0_i32_0 : i32, i32
  }
  func.func @transform_2(%arg0: i32) -> (i32, i32) {
    %c0_i32 = arith.constant 0 : i32
    %c0_i32_0 = arith.constant 0 : i32
    %c0_i32_1 = arith.constant 0 : i32
    return %c0_i32, %c0_i32_0 : i32, i32
  }
  func.func @transform_3(%arg0: i32) -> (i32, i32) {
    %c0_i32 = arith.constant 0 : i32
    %c0_i32_0 = arith.constant 0 : i32
    %c0_i32_1 = arith.constant 0 : i32
    return %c0_i32, %c0_i32_0 : i32, i32
  }
  func.func @transform_4(%arg0: i32) -> (i32, i32) {
    %c0_i32 = arith.constant 0 : i32
    %c0_i32_0 = arith.constant 0 : i32
    %c0_i32_1 = arith.constant 0 : i32
    return %c0_i32, %c0_i32_0 : i32, i32
  }
  func.func @transform_5(%arg0: i32) -> (i32, i32) {
    %c0_i32 = arith.constant 0 : i32
    %c0_i32_0 = arith.constant 0 : i32
    %c0_i32_1 = arith.constant 0 : i32
    return %c0_i32, %c0_i32_0 : i32, i32
  }
  func.func @transform_6(%arg0: i32) -> (i32, i32) {
    %c0_i32 = arith.constant 0 : i32
    %c0_i32_0 = arith.constant 0 : i32
    %c0_i32_1 = arith.constant 0 : i32
    return %c0_i32, %c0_i32_0 : i32, i32
  }
  func.func @transform_7(%arg0: i32) -> (i32, i32) {
    %c0_i32 = arith.constant 0 : i32
    %c0_i32_0 = arith.constant 0 : i32
    %c0_i32_1 = arith.constant 0 : i32
    return %c0_i32, %c0_i32_0 : i32, i32
  }
  func.func @transform_8(%arg0: i32) -> (i32, i32) {
    %c0_i32 = arith.constant 0 : i32
    %c0_i32_0 = arith.constant 0 : i32
    %c0_i32_1 = arith.constant 0 : i32
    return %c0_i32, %c0_i32_0 : i32, i32
  }
  func.func @transform_9(%arg0: i32) -> (i32, i32) {
    %c0_i32 = arith.constant 0 : i32
    %c0_i32_0 = arith.constant 0 : i32
    %c0_i32_1 = arith.constant 0 : i32
    return %c0_i32, %c0_i32_0 : i32, i32
  }
  func.func @transform_10(%arg0: i32) -> (i32, i32) {
    %c0_i32 = arith.constant 0 : i32
    %c0_i32_0 = arith.constant 0 : i32
    %c0_i32_1 = arith.constant 0 : i32
    return %c0_i32, %c0_i32_0 : i32, i32
  }
  func.func @transform_11(%arg0: i32) -> (i32, i32) {
    %c0_i32 = arith.constant 0 : i32
    %c0_i32_0 = arith.constant 0 : i32
    %c0_i32_1 = arith.constant 0 : i32
    return %c0_i32, %c0_i32_0 : i32, i32
  }
  func.func @transform_12(%arg0: i32) -> (i32, i32) {
    %c0_i32 = arith.constant 0 : i32
    %c0_i32_0 = arith.constant 0 : i32
    %c0_i32_1 = arith.constant 0 : i32
    return %c0_i32, %c0_i32_0 : i32, i32
  }
  func.func @transform_13(%arg0: i32) -> (i32, i32) {
    %c0_i32 = arith.constant 0 : i32
    %c0_i32_0 = arith.constant 0 : i32
    return %c0_i32, %arg0 : i32, i32
  }
}

</mosaic_0001>

<bundles_post_ra>
// kernel: tpu_custom_call.1
= control target key start
LH: loop header
LB: loop body
LE: loop exit
PB: predicated region body
PF: predicated region fallthrough
CT: control target
= control target key end

     0   :  { %18 = vsyncpa [#allocation3], 0  ;;  %s2310_s0 = inlined_call_operand.vmem [shape: bf16[8,32], index: 0, kind: input, shape index: {}]   ;;  %s2311_s1 = inlined_call_operand.hbm [shape: bf16[32,256], index: 1, kind: input, shape index: {}]   ;;  %s2312_s2 = inlined_call_operand.vmem [shape: f32[1,256], index: 2, kind: input, shape index: {}]   ;;  %s2313_s3 = inlined_call_operand.hbm [shape: bf16[256,256], index: 3, kind: input, shape index: {}]   ;;  %s2314_s4 = inlined_call_operand.hbm [shape: f32[1,256], index: 4, kind: input, shape index: {}]   ;;  %s2315_s5 = inlined_call_operand.hbm [shape: bf16[256,256], index: 5, kind: input, shape index: {}]   ;;  %s2316_s6 = inlined_call_operand.hbm [shape: f32[1,256], index: 6, kind: input, shape index: {}]   ;;  %s2317_s7 = inlined_call_operand.hbm [shape: bf16[256,256], index: 7, kind: input, shape index: {}]   ;;  %s2318_s8 = inlined_call_operand.vmem [shape: f32[1,256], index: 8, kind: input, shape index: {}]   ;;  %s2319_s9 = inlined_call_operand.hbm [shape: bf16[256,256], index: 9, kind: input, shape index: {}]   ;;  %s2320_s10 = inlined_call_operand.vmem [shape: f32[1,256], index: 10, kind: input, shape index: {}]   ;;  %s2321_s11 = inlined_call_operand.vmem [shape: bf16[8,256], index: 11, kind: input, shape index: {}]   ;;  %s2322_s12 = inlined_call_operand.vmem [shape: f32[8,1], index: 12, kind: input, shape index: {}]   ;;  %s2323_s13 = inlined_call_operand.hbm [shape: f32[8,8], index: 13, kind: output, shape index: {}]  }
   0x1   :  { %19 = vsyncpa [#allocation6], 0 }
   0x2   :  { %20 = vsyncpa [#allocation9], 0 }
   0x3   :  { %21 = vsyncpa [#allocation12], 0 }
   0x4   :  { %22 = vsyncpa [#allocation4], 0  ;;  %s44_s27 = sshll.u32 %s2313_s3, 4  ;;  %s2170_s28 = smov [#allocation5]   ;;  %s45_s27 = int_to_ptr.hbm [resolvable:$true] %s44_s27 }
   0x5   :  { %s46_s29 = sshll.u32 %s2170_s28, 4  ;;  %s68_s15 = sshll.u32 %s2315_s5, 4  ;;  %s47_s29 = int_to_ptr.vmem [resolvable:$true] %s46_s29  ;;  %s69_s15 = int_to_ptr.hbm [resolvable:$true] %s68_s15 }
   0x6   :  { %s2171_s16 = smov 128   ;;  %s2172_s17 = smov 8  }
   0x7   :  { %52 = dma.hbm_to_vmem [thread:$0]  %s45_s27, 4096, %s47_s29, [#allocation6], %s2171_s16, %s2171_s16, %s2172_s17  }
   0x8   :  { %s2173_s18 = smov [#allocation8]   ;;  %s92_s3 = sshll.u32 %s2317_s7, 4  ;;  %s93_s3 = int_to_ptr.hbm [resolvable:$true] %s92_s3 }
   0x9   :  { %s70_s19 = sshll.u32 %s2173_s18, 4  ;;  %s29_s23 = sshll.u32 %s2311_s1, 4  ;;  %s71_s19 = int_to_ptr.vmem [resolvable:$true] %s70_s19  ;;  %s30_s23 = int_to_ptr.hbm [resolvable:$true] %s29_s23 }
   0xa   :  { %76 = dma.hbm_to_vmem [thread:$0]  %s69_s15, 4096, %s71_s19, [#allocation9], %s2171_s16, %s2171_s16, %s2172_s17  }
   0xb   :  { %s2174_s24 = smov [#allocation11]   ;;  %s2175_s26 = smov [#allocation2]  }
   0xc   :  { %s94_s25 = sshll.u32 %s2174_s24, 4  ;;  %s31_s7 = sshll.u32 %s2175_s26, 4  ;;  %s95_s25 = int_to_ptr.vmem [resolvable:$true] %s94_s25  ;;  %s32_s7 = int_to_ptr.vmem [resolvable:$true] %s31_s7 }
   0xd   :  { %100 = dma.hbm_to_vmem [thread:$0]  %s93_s3, 4096, %s95_s25, [#allocation12], %s2171_s16, %s2171_s16, %s2172_s17  }
   0xe   :  { %s58_s29 = sshll.u32 %s2314_s4, 4  ;;  %s82_s14 = sshll.u32 %s2316_s6, 4  ;;  %s59_s29 = int_to_ptr.hbm [resolvable:$true] %s58_s29  ;;  %s83_s14 = int_to_ptr.hbm [resolvable:$true] %s82_s14 }
   0xf   :  { %37 = dma.hbm_to_vmem [thread:$0]  %s30_s23, 512, %s32_s7, [#allocation3], %s2171_s16, %s2171_s16, %s2172_s17  }
  0x10   :  { %s2176_s15 = smov [#allocation7]   ;;  %s2177_s19 = smov [#allocation10]  }
  0x11   :  { %s60_s18 = sshll.u32 %s2176_s15, 4  ;;  %s84_s20 = sshll.u32 %s2177_s19, 4  ;;  %s61_s18 = int_to_ptr.vmem [resolvable:$true] %s60_s18  ;;  %s85_s20 = int_to_ptr.vmem [resolvable:$true] %s84_s20 }
  0x12   :  { %63 = dma.hbm_to_vmem [thread:$0]  %s59_s29, 32, %s61_s18, [#allocation6]  }
  0x13   :  { %s107_s4 = sshll.u32 %s2319_s9, 4  ;;  %s2178_s5 = smov [#allocation13]   ;;  %s108_s4 = int_to_ptr.hbm [resolvable:$true] %s107_s4 }
  0x14   :  { %87 = dma.hbm_to_vmem [thread:$0]  %s83_s14, 32, %s85_s20, [#allocation9]  }
  0x15   :  { %s109_s22 = sshll.u32 %s2178_s5, 4  ;;  %s110_s22 = int_to_ptr.vmem [resolvable:$true] %s109_s22 }
  0x16   :  { %115 = dma.hbm_to_vmem [thread:$0]  %s108_s4, 4096, %s110_s22, [#allocation12], %s2171_s16, %s2171_s16, %s2172_s17  }
  0x17   :  { %2160 = dma.done.wait [#allocation3], 512  }
  0x18   :  { %2161 = vsyncadd [#allocation3], 4294966784 }
  0x19   :  { %2162 = dma.done.wait [#allocation6], 4128  }
  0x1a   :  { %2163 = vsyncadd [#allocation6], 4294963168 }
  0x1b   :  { %2164 = dma.done.wait [#allocation9], 4128  }
  0x1c   :  { %2165 = vsyncadd [#allocation9], 4294963168 }
  0x1d   :  { %2166 = dma.done.wait [#allocation12], 8192  }
  0x1e   :  { %2167 = vsyncadd [#allocation12], 4294959104  ;;  %v1304_v0 = vld [vmem:[#allocation2 + $0x10] sm:$0xf]  ;;  %v1827_v1 = vld [vmem:[#allocation2 + $0x14] sm:$0xf0] }
  0x1f   :  { %v1826_v2 = vld [vmem:[#allocation2 + $0x14] sm:$0xf]  ;;  %v1305_v3 = vor.u32 %v1827_v1, %v1304_v0  ;;  %v1306_v4 = vld [vmem:[#allocation2 + $0x18] sm:$0xf0]  ;;  %v1296_v5 = vld [vmem:[#allocation2] sm:$0xf] }
  0x20   :  { %v1825_v6 = vld [vmem:[#allocation2 + $0x4] sm:$0xf0]  ;;  %v1309_v7 = vor.u32 %v1826_v2, %v1306_v4  ;;  %v1824_v8 = vld [vmem:[#allocation2 + $0x4] sm:$0xf]  ;;  %v1298_v9 = vld [vmem:[#allocation2 + $0x8] sm:$0xf0] }
  0x21   :  { %vm182_vm0 = vcmask 261120   ;;  %192 = vmatpush.bf16.msra.mxu0 %v1305_v3  ;;  %v1297_v10 = vor.u32 %v1825_v6, %v1296_v5  ;;  %v1370_v11 = vld [vmem:[#allocation5 + $0x70] sm:$0xf]  ;;  %v1843_v12 = vld [vmem:[#allocation5 + $0x74] sm:$0xf0]  ;;  %v1301_v14 = vor.u32 %v1824_v8, %v1298_v9  ;;  %s1281_s28 = sshll.u32 %s2323_s13, 4  ;;  %s1282_s28 = int_to_ptr.hbm [resolvable:$true] %s1281_s28 }
  0x22   :  { %v1434_v13 = vld [vmem:[#allocation5 + $0xf0] sm:$0xf]  ;;  %205 = vmatpush.bf16.msra.mxu1 %v1309_v7  ;;  %v1371_v15 = vor.u32 %v1843_v12, %v1370_v11  ;;  %v1859_v16 = vld [vmem:[#allocation5 + $0xf4] sm:$0xf0]  ;;  %v1842_v17 = vld [vmem:[#allocation5 + $0x74] sm:$0xf] }
  0x23   :  { %v1372_v18 = vld [vmem:[#allocation5 + $0x78] sm:$0xf0]  ;;  %v151_v19 = vld [vmem:[%s2310_s0] sm:$0xf]  ;;  %v1435_v20 = vor.u32 %v1859_v16, %v1434_v13  ;;  %v1858_v22 = vld [vmem:[#allocation5 + $0xf4] sm:$0xf] }
  0x24   :  { %v1375_v21 = vor.u32 %v1842_v17, %v1372_v18  ;;  %v1436_v23 = vld [vmem:[#allocation5 + $0xf8] sm:$0xf0]  ;;  %v1362_v24 = vld [vmem:[#allocation5 + $0x60] sm:$0xf]  ;;  %414 = vmatpush.bf16.msra.mxu2 %v1371_v15  ;;  %v1841_v26 = vld [vmem:[#allocation5 + $0x64] sm:$0xf0] }
  0x25   :  { %v1439_v25 = vor.u32 %v1858_v22, %v1436_v23  ;;  %v1426_v27 = vld [vmem:[#allocation5 + $0xe0] sm:$0xf]  ;;  %v1857_v28 = vld [vmem:[#allocation5 + $0xe4] sm:$0xf0]  ;;  %193 = vmatpush.bf16.msra.mxu0 %v1297_v10  ;;  %427 = vmatpush.bf16.msra.mxu3 %v1435_v20  ;;  %v1363_v29 = vor.u32 %v1841_v26, %v1362_v24  ;;  %v1840_v31 = vld [vmem:[#allocation5 + $0x64] sm:$0xf] }
  0x26   :  { %v1427_v30 = vor.u32 %v1857_v28, %v1426_v27  ;;  %v1364_v32 = vld [vmem:[#allocation5 + $0x68] sm:$0xf0]  ;;  %v1856_v33 = vld [vmem:[#allocation5 + $0xe4] sm:$0xf]  ;;  %206 = vmatpush.bf16.msra.mxu1 %v1301_v14  ;;  %v1354_v36 = vld [vmem:[#allocation5 + $0x50] sm:$0xf] }
  0x27   :  { %v1367_v34 = vor.u32 %v1840_v31, %v1364_v32  ;;  %v1428_v35 = vld [vmem:[#allocation5 + $0xe8] sm:$0xf0]  ;;  %v1839_v37 = vld [vmem:[#allocation5 + $0x54] sm:$0xf0]  ;;  %v1418_v39 = vld [vmem:[#allocation5 + $0xd0] sm:$0xf] }
  0x28   :  { %v1431_v38 = vor.u32 %v1856_v33, %v1428_v35  ;;  %v1855_v40 = vld [vmem:[#allocation5 + $0xd4] sm:$0xf0]  ;;  %v1838_v41 = vld [vmem:[#allocation5 + $0x54] sm:$0xf]  ;;  %1310 = vmatmul.msk.bf16.vlgmr.msra.gmra.mxu0 %vm182_vm0, %v151_v19  ;;  %415 = vmatpush.bf16.msra.mxu2 %v1363_v29  ;;  %v1355_v42 = vor.u32 %v1839_v37, %v1354_v36  ;;  %v1356_v43 = vld [vmem:[#allocation5 + $0x58] sm:$0xf0] }
  0x29   :  { %440 = vmatpush.bf16.msrb.mxu0 %v1375_v21  ;;  %v1854_v44 = vld [vmem:[#allocation5 + $0xd4] sm:$0xf]  ;;  %v1420_v45 = vld [vmem:[#allocation5 + $0xd8] sm:$0xf0]  ;;  %1311 = vmatmul.msk.bf16.vlgmr.msra.gmra.mxu1 %vm182_vm0, %v151_v19  ;;  %v1419_v46 = vor.u32 %v1855_v40, %v1418_v39  ;;  %v1346_v47 = vld [vmem:[#allocation5 + $0x40] sm:$0xf]  ;;  %v1359_v49 = vor.u32 %v1838_v41, %v1356_v43 }
  0x2a   :  { %453 = vmatpush.bf16.msrb.mxu1 %v1439_v25  ;;  %428 = vmatpush.bf16.msra.mxu3 %v1427_v30  ;;  %v1837_v48 = vld [vmem:[#allocation5 + $0x44] sm:$0xf0]  ;;  %v1410_v50 = vld [vmem:[#allocation5 + $0xc0] sm:$0xf]  ;;  %v1423_v52 = vor.u32 %v1854_v44, %v1420_v45  ;;  %v1836_v53 = vld [vmem:[#allocation5 + $0x44] sm:$0xf] }
  0x2b   :  { %v1853_v51 = vld [vmem:[#allocation5 + $0xc4] sm:$0xf0]  ;;  %v1348_v54 = vld [vmem:[#allocation5 + $0x48] sm:$0xf0]  ;;  %v1347_v55 = vor.u32 %v1837_v48, %v1346_v47  ;;  %v1852_v56 = vld [vmem:[#allocation5 + $0xc4] sm:$0xf] }
  0x2c   :  { %416 = vmatpush.bf16.msra.mxu2 %v1355_v42  ;;  %v1412_v57 = vld [vmem:[#allocation5 + $0xc8] sm:$0xf0]  ;;  %v1411_v58 = vor.u32 %v1853_v51, %v1410_v50  ;;  %v1338_v59 = vld [vmem:[#allocation5 + $0x30] sm:$0xf]  ;;  %v1835_v60 = vld [vmem:[#allocation5 + $0x34] sm:$0xf0]  ;;  %v1351_v61 = vor.u32 %v1836_v53, %v1348_v54 }
  0x2d   :  { %441 = vmatpush.bf16.msrb.mxu0 %v1367_v34  ;;  %v1402_v62 = vld [vmem:[#allocation5 + $0xb0] sm:$0xf]  ;;  %v1851_v63 = vld [vmem:[#allocation5 + $0xb4] sm:$0xf0]  ;;  %v1415_v0 = vor.u32 %v1852_v56, %v1412_v57  ;;  %v1834_v1 = vld [vmem:[#allocation5 + $0x34] sm:$0xf]  ;;  %v1339_v3 = vor.u32 %v1835_v60, %v1338_v59 }
  0x2e   :  { %454 = vmatpush.bf16.msrb.mxu1 %v1431_v38  ;;  %429 = vmatpush.bf16.msra.mxu3 %v1419_v46  ;;  %v1340_v2 = vld [vmem:[#allocation5 + $0x38] sm:$0xf0]  ;;  %v1850_v4 = vld [vmem:[#allocation5 + $0xb4] sm:$0xf]  ;;  %v1403_v6 = vor.u32 %v1851_v63, %v1402_v62  ;;  %v1330_v7 = vld [vmem:[#allocation5 + $0x20] sm:$0xf] }
  0x2f   :  { %v1404_v5 = vld [vmem:[#allocation5 + $0xb8] sm:$0xf0]  ;;  %v1833_v8 = vld [vmem:[#allocation5 + $0x24] sm:$0xf0]  ;;  %v1343_v9 = vor.u32 %v1834_v1, %v1340_v2  ;;  %v1394_v10 = vld [vmem:[#allocation5 + $0xa0] sm:$0xf] }
  0x30   :  { %417 = vmatpush.bf16.msra.mxu2 %v1347_v55  ;;  %v1849_v11 = vld [vmem:[#allocation5 + $0xa4] sm:$0xf0]  ;;  %v1407_v12 = vor.u32 %v1850_v4, %v1404_v5  ;;  %v1832_v13 = vld [vmem:[#allocation5 + $0x24] sm:$0xf]  ;;  %v1332_v14 = vld [vmem:[#allocation5 + $0x28] sm:$0xf0]  ;;  %v1331_v15 = vor.u32 %v1833_v8, %v1330_v7 }
  0x31   :  { %442 = vmatpush.bf16.msrb.mxu0 %v1359_v49  ;;  %v1848_v16 = vld [vmem:[#allocation5 + $0xa4] sm:$0xf]  ;;  %v1396_v17 = vld [vmem:[#allocation5 + $0xa8] sm:$0xf0]  ;;  %v1395_v18 = vor.u32 %v1849_v11, %v1394_v10  ;;  %v1335_v19 = vor.u32 %v1832_v13, %v1332_v14  ;;  %v1322_v21 = vld [vmem:[#allocation5 + $0x10] sm:$0xf] }
  0x32   :  { %455 = vmatpush.bf16.msrb.mxu1 %v1423_v52  ;;  %430 = vmatpush.bf16.msra.mxu3 %v1411_v58  ;;  %v1399_v20 = vor.u32 %v1848_v16, %v1396_v17  ;;  %v1831_v22 = vld [vmem:[#allocation5 + $0x14] sm:$0xf0]  ;;  %v1386_v23 = vld [vmem:[#allocation5 + $0x90] sm:$0xf]  ;;  %v1830_v26 = vld [vmem:[#allocation5 + $0x14] sm:$0xf] }
  0x33   :  { %v1323_v24 = vor.u32 %v1831_v22, %v1322_v21  ;;  %v1847_v25 = vld [vmem:[#allocation5 + $0x94] sm:$0xf0]  ;;  %v1324_v27 = vld [vmem:[#allocation5 + $0x18] sm:$0xf0]  ;;  %v1846_v30 = vld [vmem:[#allocation5 + $0x94] sm:$0xf] }
  0x34   :  { %418 = vmatpush.bf16.msra.mxu2 %v1339_v3  ;;  %v1387_v28 = vor.u32 %v1847_v25, %v1386_v23  ;;  %v1327_v29 = vor.u32 %v1830_v26, %v1324_v27  ;;  %v1388_v31 = vld [vmem:[#allocation5 + $0x98] sm:$0xf0]  ;;  %v1314_v33 = vld [vmem:[#allocation5] sm:$0xf]  ;;  %v1829_v34 = vld [vmem:[#allocation5 + $0x4] sm:$0xf0] }
  0x35   :  { %443 = vmatpush.bf16.msrb.mxu0 %v1351_v61  ;;  %v1391_v32 = vor.u32 %v1846_v30, %v1388_v31  ;;  %v1378_v35 = vld [vmem:[#allocation5 + $0x80] sm:$0xf]  ;;  %v1315_v36 = vor.u32 %v1829_v34, %v1314_v33  ;;  %v1845_v37 = vld [vmem:[#allocation5 + $0x84] sm:$0xf0]  ;;  %v1828_v38 = vld [vmem:[#allocation5 + $0x4] sm:$0xf] }
  0x36   :  { %456 = vmatpush.bf16.msrb.mxu1 %v1415_v0  ;;  %431 = vmatpush.bf16.msra.mxu3 %v1403_v6  ;;  %v1316_v39 = vld [vmem:[#allocation5 + $0x8] sm:$0xf0]  ;;  %v1379_v40 = vor.u32 %v1845_v37, %v1378_v35  ;;  %v1844_v42 = vld [vmem:[#allocation5 + $0x84] sm:$0xf]  ;;  %v1562_v45 = vld [vmem:[#allocation8 + $0xf0] sm:$0xf] }
  0x37   :  { %v1319_v41 = vor.u32 %v1828_v38, %v1316_v39  ;;  %v1380_v43 = vld [vmem:[#allocation5 + $0x88] sm:$0xf0]  ;;  %v1891_v46 = vld [vmem:[#allocation8 + $0xf4] sm:$0xf0]  ;;  %v1890_v47 = vld [vmem:[#allocation8 + $0xf4] sm:$0xf] }
  0x38   :  { %419 = vmatpush.bf16.msra.mxu2 %v1331_v15  ;;  %v1383_v44 = vor.u32 %v1844_v42, %v1380_v43  ;;  %v1563_v48 = vor.u32 %v1891_v46, %v1562_v45  ;;  %v1564_v49 = vld [vmem:[#allocation8 + $0xf8] sm:$0xf0]  ;;  %v1554_v50 = vld [vmem:[#allocation8 + $0xe0] sm:$0xf]  ;;  %v1889_v51 = vld [vmem:[#allocation8 + $0xe4] sm:$0xf0] }
  0x39   :  { %444 = vmatpush.bf16.msrb.mxu0 %v1343_v9  ;;  %v1567_v52 = vor.u32 %v1890_v47, %v1564_v49  ;;  %v1888_v53 = vld [vmem:[#allocation8 + $0xe4] sm:$0xf]  ;;  %v1556_v54 = vld [vmem:[#allocation8 + $0xe8] sm:$0xf0]  ;;  %v1498_v55 = vld [vmem:[#allocation8 + $0x70] sm:$0xf]  ;;  %v1555_v56 = vor.u32 %v1889_v51, %v1554_v50 }
  0x3a   :  { %457 = vmatpush.bf16.msrb.mxu1 %v1407_v12  ;;  %432 = vmatpush.bf16.msra.mxu3 %v1395_v18  ;;  %v1875_v57 = vld [vmem:[#allocation8 + $0x74] sm:$0xf0]  ;;  %v1874_v58 = vld [vmem:[#allocation8 + $0x74] sm:$0xf]  ;;  %v1500_v59 = vld [vmem:[#allocation8 + $0x78] sm:$0xf0]  ;;  %v1559_v60 = vor.u32 %v1888_v53, %v1556_v54 }
  0x3b   :  { %v1499_v61 = vor.u32 %v1875_v57, %v1498_v55  ;;  %v1503_v62 = vor.u32 %v1874_v58, %v1500_v59  ;;  %v1546_v63 = vld [vmem:[#allocation8 + $0xd0] sm:$0xf]  ;;  %v1887_v0 = vld [vmem:[#allocation8 + $0xd4] sm:$0xf0]  ;;  %v1886_v1 = vld [vmem:[#allocation8 + $0xd4] sm:$0xf] }
  0x3c   :  { %420 = vmatpush.bf16.msra.mxu2 %v1323_v24  ;;  %v1548_v2 = vld [vmem:[#allocation8 + $0xd8] sm:$0xf0]  ;;  %v1490_v3 = vld [vmem:[#allocation8 + $0x60] sm:$0xf]  ;;  %v1873_v4 = vld [vmem:[#allocation8 + $0x64] sm:$0xf0]  ;;  %v1547_v8 = vor.u32 %v1887_v0, %v1546_v63 }
  0x3d   :  { %445 = vmatpush.bf16.msrb.mxu0 %v1335_v19  ;;  %v1491_v5 = vor.u32 %v1873_v4, %v1490_v3  ;;  %v1872_v6 = vld [vmem:[#allocation8 + $0x64] sm:$0xf]  ;;  %v1492_v7 = vld [vmem:[#allocation8 + $0x68] sm:$0xf0]  ;;  %v1538_v10 = vld [vmem:[#allocation8 + $0xc0] sm:$0xf]  ;;  %v1551_v12 = vor.u32 %v1886_v1, %v1548_v2 }
  0x3e   :  { %458 = vmatpush.bf16.msrb.mxu1 %v1399_v20  ;;  %433 = vmatpush.bf16.msra.mxu3 %v1387_v28  ;;  %v1495_v9 = vor.u32 %v1872_v6, %v1492_v7  ;;  %v1885_v11 = vld [vmem:[#allocation8 + $0xc4] sm:$0xf0]  ;;  %v1482_v13 = vld [vmem:[#allocation8 + $0x50] sm:$0xf]  ;;  %v1871_v14 = vld [vmem:[#allocation8 + $0x54] sm:$0xf0] }
  0x3f   :  { %v1870_v15 = vld [vmem:[#allocation8 + $0x54] sm:$0xf]  ;;  %v1884_v16 = vld [vmem:[#allocation8 + $0xc4] sm:$0xf]  ;;  %v1540_v17 = vld [vmem:[#allocation8 + $0xc8] sm:$0xf0]  ;;  %v1483_v19 = vor.u32 %v1871_v14, %v1482_v13  ;;  %v1539_v22 = vor.u32 %v1885_v11, %v1538_v10 }
  0x40   :  { %421 = vmatpush.bf16.msra.mxu2 %v1315_v36  ;;  %v1484_v18 = vld [vmem:[#allocation8 + $0x58] sm:$0xf0]  ;;  %v1474_v21 = vld [vmem:[#allocation8 + $0x40] sm:$0xf]  ;;  %v1869_v23 = vld [vmem:[#allocation8 + $0x44] sm:$0xf0]  ;;  %v1543_v26 = vor.u32 %v1884_v16, %v1540_v17 }
  0x41   :  { %446 = vmatpush.bf16.msrb.mxu0 %v1327_v29  ;;  %v1487_v20 = vor.u32 %v1870_v15, %v1484_v18  ;;  %v1868_v24 = vld [vmem:[#allocation8 + $0x44] sm:$0xf]  ;;  %v1476_v25 = vld [vmem:[#allocation8 + $0x48] sm:$0xf0]  ;;  %v1530_v27 = vld [vmem:[#allocation8 + $0xb0] sm:$0xf]  ;;  %v1475_v31 = vor.u32 %v1869_v23, %v1474_v21 }
  0x42   :  { %459 = vmatpush.bf16.msrb.mxu1 %v1391_v32  ;;  %434 = vmatpush.bf16.msra.mxu3 %v1379_v40  ;;  %v1883_v28 = vld [vmem:[#allocation8 + $0xb4] sm:$0xf0]  ;;  %v1882_v29 = vld [vmem:[#allocation8 + $0xb4] sm:$0xf]  ;;  %v1532_v30 = vld [vmem:[#allocation8 + $0xb8] sm:$0xf0]  ;;  %v1479_v32 = vor.u32 %v1868_v24, %v1476_v25 }
  0x43   :  { %v1531_v33 = vor.u32 %v1883_v28, %v1530_v27  ;;  %v1535_v34 = vor.u32 %v1882_v29, %v1532_v30  ;;  %v1522_v35 = vld [vmem:[#allocation8 + $0xa0] sm:$0xf]  ;;  %v1881_v36 = vld [vmem:[#allocation8 + $0xa4] sm:$0xf0]  ;;  %v156_v37 = vld [vmem:[%s2312_s2] sm:$0x3] }
  0x44   :  { %668 = vmatpush.bf16.msrb.mxu2 %v1499_v61  ;;  %v1880_v38 = vld [vmem:[#allocation8 + $0xa4] sm:$0xf]  ;;  %v1524_v39 = vld [vmem:[#allocation8 + $0xa8] sm:$0xf0]  ;;  %v1523_v40 = vor.u32 %v1881_v36, %v1522_v35  ;;  %v159_v43 = vperm.slane %v156_v37, 1  ;;  %vm1272_vm1 = vcmask 64512  }
  0x45   :  { %447 = vmatpush.bf16.msrb.mxu0 %v1319_v41  ;;  %v158_v41 = vperm.slane %v156_v37, 0  ;;  %v1527_v42 = vor.u32 %v1880_v38, %v1524_v39  ;;  %v1466_v54 = vld [vmem:[#allocation8 + $0x30] sm:$0xf]  ;;  %v1867_v55 = vld [vmem:[#allocation8 + $0x34] sm:$0xf0] }
  0x46   :  { %460 = vmatpush.bf16.msrb.mxu1 %v1383_v44  ;;  %681 = vmatpush.bf16.msrb.mxu3 %v1563_v48  ;;  %v1467_v57 = vor.u32 %v1867_v55, %v1466_v54  ;;  %v1468_v58 = vld [vmem:[#allocation8 + $0x38] sm:$0xf0]  ;;  %v1879_v61 = vld [vmem:[#allocation8 + $0x94] sm:$0xf0]  ;;  %v1458_v2 = vld [vmem:[#allocation8 + $0x20] sm:$0xf] }
  0x47   :  { %v1516_v0 = vld [vmem:[#allocation8 + $0x98] sm:$0xf0]  ;;  %v1865_v3 = vld [vmem:[#allocation8 + $0x24] sm:$0xf0]  ;;  %v1864_v4 = vld [vmem:[#allocation8 + $0x24] sm:$0xf] }
  0x48   :  { %669 = vmatpush.bf16.msrb.mxu2 %v1491_v5  ;;  %v1459_v5 = vor.u32 %v1865_v3, %v1458_v2  ;;  %v1460_v6 = vld [vmem:[#allocation8 + $0x28] sm:$0xf0]  ;;  %v1876_v10 = vld [vmem:[#allocation8 + $0x84] sm:$0xf]  ;;  %v1450_v14 = vld [vmem:[#allocation8 + $0x10] sm:$0xf] }
  0x49   :  { %694 = vmatpush.bf16.msra.mxu0 %v1503_v62  ;;  %v1878_v62 = vld [vmem:[#allocation8 + $0x94] sm:$0xf]  ;;  %v1463_v7 = vor.u32 %v1864_v4, %v1460_v6  ;;  %v1863_v15 = vld [vmem:[#allocation8 + $0x14] sm:$0xf0]  ;;  %v1452_v18 = vld [vmem:[#allocation8 + $0x18] sm:$0xf0] }
  0x4a   :  { %707 = vmatpush.bf16.msra.mxu1 %v1567_v52  ;;  %682 = vmatpush.bf16.msrb.mxu3 %v1555_v56  ;;  %v1866_v56 = vld [vmem:[#allocation8 + $0x34] sm:$0xf]  ;;  %v1519_v1 = vor.u32 %v1878_v62, %v1516_v0  ;;  %v1451_v16 = vor.u32 %v1863_v15, %v1450_v14  ;;  %v1861_v21 = vld [vmem:[#allocation8 + $0x4] sm:$0xf0]  ;;  %v1444_v24 = vld [vmem:[#allocation8 + $0x8] sm:$0xf0] }
  0x4b   :  { %v1471_v59 = vor.u32 %v1866_v56, %v1468_v58  ;;  %v1862_v17 = vld [vmem:[#allocation8 + $0x14] sm:$0xf]  ;;  %v1923_v27 = vld [vmem:[#allocation11 + $0xf4] sm:$0xf0]  ;;  %v1692_v30 = vld [vmem:[#allocation11 + $0xf8] sm:$0xf0] }
  0x4c   :  { %670 = vmatpush.bf16.msrb.mxu2 %v1483_v19  ;;  %v1455_v19 = vor.u32 %v1862_v17, %v1452_v18  ;;  %v1922_v28 = vld [vmem:[#allocation11 + $0xf4] sm:$0xf]  ;;  %v1684_v35 = vld [vmem:[#allocation11 + $0xe8] sm:$0xf0]  ;;  %v1626_v36 = vld [vmem:[#allocation11 + $0x70] sm:$0xf] }
  0x4d   :  { %695 = vmatpush.bf16.msra.mxu0 %v1495_v9  ;;  %v1877_v9 = vld [vmem:[#allocation8 + $0x84] sm:$0xf0]  ;;  %v1907_v38 = vld [vmem:[#allocation11 + $0x74] sm:$0xf0]  ;;  %v1906_v39 = vld [vmem:[#allocation11 + $0x74] sm:$0xf] }
  0x4e   :  { %708 = vmatpush.bf16.msra.mxu1 %v1559_v60  ;;  %683 = vmatpush.bf16.msrb.mxu3 %v1547_v8  ;;  %v1514_v60 = vld [vmem:[#allocation8 + $0x90] sm:$0xf]  ;;  %v1506_v8 = vld [vmem:[#allocation8 + $0x80] sm:$0xf]  ;;  %v1917_v56 = vld [vmem:[#allocation11 + $0xc4] sm:$0xf0] }
  0x4f   :  { %v1515_v63 = vor.u32 %v1879_v61, %v1514_v60  ;;  %v1507_v11 = vor.u32 %v1877_v9, %v1506_v8  ;;  %v1666_v55 = vld [vmem:[#allocation11 + $0xc0] sm:$0xf]  ;;  %v1610_v58 = vld [vmem:[#allocation11 + $0x50] sm:$0xf]  ;;  %v1902_v60 = vld [vmem:[#allocation11 + $0x54] sm:$0xf] }
  0x50   :  { %671 = vmatpush.bf16.msrb.mxu2 %v1475_v31  ;;  %v1682_v31 = vld [vmem:[#allocation11 + $0xe0] sm:$0xf]  ;;  %v1916_v61 = vld [vmem:[#allocation11 + $0xc4] sm:$0xf]  ;;  %v1668_v62 = vld [vmem:[#allocation11 + $0xc8] sm:$0xf0]  ;;  %v1667_v3 = vor.u32 %v1917_v56, %v1666_v55 }
  0x51   :  { %696 = vmatpush.bf16.msra.mxu0 %v1487_v20  ;;  %v1442_v20 = vld [vmem:[#allocation8] sm:$0xf]  ;;  %v248_v2 = vld [vmem:[#allocation7] sm:$0x3]  ;;  %v1671_v4 = vor.u32 %v1916_v61, %v1668_v62  ;;  %v1896_v55 = vld [vmem:[#allocation11 + $0x24] sm:$0xf] }
  0x52   :  { %709 = vmatpush.bf16.msra.mxu1 %v1551_v12  ;;  %684 = vmatpush.bf16.msrb.mxu3 %v1539_v22  ;;  %v1508_v12 = vld [vmem:[#allocation8 + $0x88] sm:$0xf0]  ;;  %v1860_v22 = vld [vmem:[#allocation8 + $0x4] sm:$0xf]  ;;  %v1443_v23 = vor.u32 %v1861_v21, %v1442_v20 }
  0x53   :  { %v1511_v13 = vor.u32 %v1876_v10, %v1508_v12  ;;  %v1447_v25 = vor.u32 %v1860_v22, %v1444_v24  ;;  %v250_v10 = vperm.slane %v248_v2, 0  ;;  %v1915_v24 = vld [vmem:[#allocation11 + $0xb4] sm:$0xf0]  ;;  %v1908_v61 = vld [vmem:[#allocation11 + $0x84] sm:$0xf] }
  0x54   :  { %672 = vmatpush.bf16.msrb.mxu2 %v1467_v57 }
  0x55   :  { %697 = vmatpush.bf16.msra.mxu0 %v1479_v32  ;;  %v1921_v32 = vld [vmem:[#allocation11 + $0xe4] sm:$0xf0] }
  0x56   :  { %710 = vmatpush.bf16.msra.mxu1 %v1543_v26  ;;  %685 = vmatpush.bf16.msrb.mxu3 %v1531_v33  ;;  %v1690_v26 = vld [vmem:[#allocation11 + $0xf0] sm:$0xf]  ;;  %v1695_v33 = vor.u32 %v1922_v28, %v1692_v30  ;;  %v1683_v37 = vor.u32 %v1921_v32, %v1682_v31  ;;  %v1901_v30 = vld [vmem:[#allocation11 + $0x44] sm:$0xf0]  ;;  %v1900_v31 = vld [vmem:[#allocation11 + $0x44] sm:$0xf] }
  0x57   :  { %v1691_v29 = vor.u32 %v1923_v27, %v1690_v26  ;;  %v1660_v27 = vld [vmem:[#allocation11 + $0xb8] sm:$0xf0] }
  0x58   :  { %673 = vmatpush.bf16.msrb.mxu2 %v1459_v5  ;;  %v251_v5 = vperm.slane %v248_v2, 1  ;;  %v1895_v2 = vld [vmem:[#allocation11 + $0x14] sm:$0xf0] }
  0x59   :  { %698 = vmatpush.bf16.msra.mxu0 %v1471_v59  ;;  %v1903_v59 = vld [vmem:[#allocation11 + $0x54] sm:$0xf0] }
  0x5a   :  { %711 = vmatpush.bf16.msra.mxu1 %v1535_v34  ;;  %686 = vmatpush.bf16.msrb.mxu3 %v1523_v40  ;;  %v1920_v34 = vld [vmem:[#allocation11 + $0xe4] sm:$0xf]  ;;  %v1628_v40 = vld [vmem:[#allocation11 + $0x78] sm:$0xf0]  ;;  %v1611_v0 = vor.u32 %v1903_v59, %v1610_v58  ;;  %v1634_v59 = vld [vmem:[#allocation11 + $0x80] sm:$0xf] }
  0x5c   :  { %674 = vmatpush.bf16.msrb.mxu2 %v1451_v16 }
  0x5d   :  { %699 = vmatpush.bf16.msra.mxu0 %v1463_v7 }
  0x5e   :  { %712 = vmatpush.bf16.msra.mxu1 %v1527_v42  ;;  %687 = vmatpush.bf16.msrb.mxu3 %v1515_v63  ;;  %v1627_v42 = vor.u32 %v1907_v38, %v1626_v36  ;;  %v1612_v63 = vld [vmem:[#allocation11 + $0x58] sm:$0xf0]  ;;  %v1912_v38 = vld [vmem:[#allocation11 + $0xa4] sm:$0xf] }
  0x60   :  { %675 = vmatpush.bf16.msrb.mxu2 %v1443_v23  ;;  %v1658_v23 = vld [vmem:[#allocation11 + $0xb0] sm:$0xf] }
  0x61   :  { %700 = vmatpush.bf16.msra.mxu0 %v1455_v19  ;;  %v1659_v26 = vor.u32 %v1915_v24, %v1658_v23  ;;  %v1754_v23 = vld [vmem:[#allocation13 + $0x70] sm:$0xf] }
  0x62   :  { %713 = vmatpush.bf16.msra.mxu1 %v1519_v1  ;;  %688 = vmatpush.bf16.msrb.mxu3 %v1507_v11  ;;  %v1615_v1 = vor.u32 %v1902_v60, %v1612_v63  ;;  %v1909_v60 = vld [vmem:[#allocation11 + $0x84] sm:$0xf0]  ;;  %v1636_v63 = vld [vmem:[#allocation11 + $0x88] sm:$0xf0] }
  0x63   :  { %v1635_v62 = vor.u32 %v1909_v60, %v1634_v59 }
  0x65   :  { %701 = vmatpush.bf16.msra.mxu0 %v1447_v25  ;;  %v1914_v25 = vld [vmem:[#allocation11 + $0xb4] sm:$0xf] }
  0x66   :  { %714 = vmatpush.bf16.msra.mxu1 %v1511_v13  ;;  %v1663_v28 = vor.u32 %v1914_v25, %v1660_v27  ;;  %v1939_v25 = vld [vmem:[#allocation13 + $0x74] sm:$0xf0]  ;;  %v1756_v27 = vld [vmem:[#allocation13 + $0x78] sm:$0xf0] }
  0xa5   :  { %v195_v44 = vpop.f32.mrf.mxu0 }
  0xa6   :  { %v196_v45 = vadd.f32 %v195_v44, %v158_v41  ;;  %v208_v46 = vpop.f32.mrf.mxu1  ;;  %v1687_v41 = vor.u32 %v1920_v34, %v1684_v35  ;;  %v1674_v44 = vld [vmem:[#allocation11 + $0xd0] sm:$0xf]  ;;  %v1650_v34 = vld [vmem:[#allocation11 + $0xa0] sm:$0xf]  ;;  %v1913_v35 = vld [vmem:[#allocation11 + $0xa4] sm:$0xf0] }
  0xa7   :  { %v209_v47 = vadd.f32 %v208_v46, %v159_v43  ;;  %v1631_v43 = vor.u32 %v1906_v39, %v1628_v40  ;;  %v1918_v46 = vld [vmem:[#allocation11 + $0xd4] sm:$0xf]  ;;  %v1652_v39 = vld [vmem:[#allocation11 + $0xa8] sm:$0xf0] }
  0xa8   :  { %v212_v48 = vmax.f32 %v196_v45, 0.0  ;;  %v1919_v45 = vld [vmem:[#allocation11 + $0xd4] sm:$0xf0]  ;;  %v1655_v40 = vor.u32 %v1912_v38, %v1652_v39  ;;  %v1936_v38 = vld [vmem:[#allocation13 + $0x64] sm:$0xf] }
  0xa9   :  { %v213_v49 = vmax.f32 %v209_v47, 0.0  ;;  %v1676_v47 = vld [vmem:[#allocation11 + $0xd8] sm:$0xf0]  ;;  %v1748_v39 = vld [vmem:[#allocation13 + $0x68] sm:$0xf0] }
  0xaa   :  { %v214_v50 = vpack.c.bf16 %v212_v48, %v212_v48  ;;  %v1618_v48 = vld [vmem:[#allocation11 + $0x60] sm:$0xf]  ;;  %v1679_v57 = vor.u32 %v1918_v46, %v1676_v47  ;;  %v1642_v47 = vld [vmem:[#allocation11 + $0x90] sm:$0xf] }
  0xab   :  { %v215_v51 = vpack.c.bf16 %v213_v49, %v213_v49  ;;  %v1905_v49 = vld [vmem:[#allocation11 + $0x64] sm:$0xf0] }
  0xac   :  { %422 = vmatmul.bf16.vlgmr.msra.gmra.mxu2 %v214_v50  ;;  %448 = vmatmul.bf16.vlgmr.msrb.gmra.mxu0 %v214_v50  ;;  %v1619_v50 = vor.u32 %v1905_v49, %v1618_v48  ;;  %v1911_v48 = vld [vmem:[#allocation11 + $0x94] sm:$0xf0] }
  0xad   :  { %435 = vmatmul.bf16.vlgmr.msra.gmra.mxu3 %v215_v51  ;;  %461 = vmatmul.bf16.vlgmr.msrb.gmra.mxu1 %v215_v51  ;;  %v197_v52 = vpop.f32.mrf.mxu0  ;;  %v1904_v51 = vld [vmem:[#allocation11 + $0x64] sm:$0xf]  ;;  %v1643_v49 = vor.u32 %v1911_v48, %v1642_v47  ;;  %v1934_v47 = vld [vmem:[#allocation13 + $0x54] sm:$0xf] }
  0xae   :  { %v210_v53 = vpop.f32.mrf.mxu1  ;;  %935 = vmatpush.bf16.msra.mxu3 %v1691_v29  ;;  %961 = vmatpush.bf16.msrb.mxu1 %v1695_v33  ;;  %v1620_v52 = vld [vmem:[#allocation11 + $0x68] sm:$0xf0]  ;;  %v1602_v29 = vld [vmem:[#allocation11 + $0x40] sm:$0xf]  ;;  %v1948_v48 = vld [vmem:[#allocation13 + $0xc4] sm:$0xf] }
  0xaf   :  { %922 = vmatpush.bf16.msra.mxu2 %v1627_v42  ;;  %948 = vmatpush.bf16.msrb.mxu0 %v1631_v43  ;;  %v1675_v53 = vor.u32 %v1919_v45, %v1674_v44  ;;  %v1623_v54 = vor.u32 %v1904_v51, %v1620_v52  ;;  %v1603_v32 = vor.u32 %v1901_v30, %v1602_v29  ;;  %v1604_v33 = vld [vmem:[#allocation11 + $0x48] sm:$0xf0]  ;;  %v1899_v42 = vld [vmem:[#allocation11 + $0x34] sm:$0xf0]  ;;  %v1898_v43 = vld [vmem:[#allocation11 + $0x34] sm:$0xf] }
  0xb0   :  { %v1607_v36 = vor.u32 %v1900_v31, %v1604_v33  ;;  %v1596_v45 = vld [vmem:[#allocation11 + $0x38] sm:$0xf0]  ;;  %v1755_v29 = vor.u32 %v1939_v25, %v1754_v23  ;;  %v1802_v31 = vld [vmem:[#allocation13 + $0xd0] sm:$0xf]  ;;  %v1950_v33 = vld [vmem:[#allocation13 + $0xd4] sm:$0xf] }
  0xb1   :  { %v1599_v46 = vor.u32 %v1898_v43, %v1596_v45  ;;  %v1644_v51 = vld [vmem:[#allocation11 + $0x98] sm:$0xf0]  ;;  %v1949_v43 = vld [vmem:[#allocation13 + $0xc4] sm:$0xf0]  ;;  %v1738_v45 = vld [vmem:[#allocation13 + $0x50] sm:$0xf] }
  0xb2   :  { %936 = vmatpush.bf16.msra.mxu3 %v1683_v37  ;;  %962 = vmatpush.bf16.msrb.mxu1 %v1687_v41  ;;  %v1651_v37 = vor.u32 %v1913_v35, %v1650_v34  ;;  %v1594_v41 = vld [vmem:[#allocation11 + $0x30] sm:$0xf]  ;;  %v1804_v34 = vld [vmem:[#allocation13 + $0xd8] sm:$0xf0]  ;;  %v1746_v35 = vld [vmem:[#allocation13 + $0x60] sm:$0xf] }
  0xb3   :  { %923 = vmatpush.bf16.msra.mxu2 %v1619_v50  ;;  %949 = vmatpush.bf16.msrb.mxu0 %v1623_v54  ;;  %v1595_v44 = vor.u32 %v1899_v42, %v1594_v41  ;;  %v1910_v50 = vld [vmem:[#allocation11 + $0x94] sm:$0xf]  ;;  %v1897_v54 = vld [vmem:[#allocation11 + $0x24] sm:$0xf0]  ;;  %v1751_v41 = vor.u32 %v1936_v38, %v1748_v39  ;;  %v1794_v42 = vld [vmem:[#allocation13 + $0xc0] sm:$0xf] }
  0xb4   :  { %v1647_v52 = vor.u32 %v1910_v50, %v1644_v51  ;;  %v1740_v50 = vld [vmem:[#allocation13 + $0x58] sm:$0xf0]  ;;  %v1944_v25 = vld [vmem:[#allocation13 + $0xa4] sm:$0xf] }
  0xb5   :  { %v1772_v38 = vld [vmem:[#allocation13 + $0x98] sm:$0xf0] }
  0xb6   :  { %937 = vmatpush.bf16.msra.mxu3 %v1675_v53  ;;  %963 = vmatpush.bf16.msrb.mxu1 %v1679_v57  ;;  %v1586_v53 = vld [vmem:[#allocation11 + $0x20] sm:$0xf]  ;;  %v1588_v57 = vld [vmem:[#allocation11 + $0x28] sm:$0xf0] }
  0xb7   :  { %924 = vmatpush.bf16.msra.mxu2 %v1611_v0  ;;  %950 = vmatpush.bf16.msrb.mxu0 %v1615_v1  ;;  %v1587_v56 = vor.u32 %v1897_v54, %v1586_v53  ;;  %v1591_v58 = vor.u32 %v1896_v55, %v1588_v57  ;;  %v1639_v0 = vor.u32 %v1908_v61, %v1636_v63  ;;  %v1578_v1 = vld [vmem:[#allocation11 + $0x10] sm:$0xf]  ;;  %v502_v54 = vld [vmem:[#allocation10] sm:$0x3] }
  0xb8   :  { %v1795_v55 = vor.u32 %v1949_v43, %v1794_v42  ;;  %v505_v57 = vperm.slane %v502_v54, 1  ;;  %v504_v63 = vperm.slane %v502_v54, 0  ;;  %v1928_v42 = vld [vmem:[#allocation13 + $0x24] sm:$0xf] }
  0xba   :  { %938 = vmatpush.bf16.msra.mxu3 %v1667_v3  ;;  %964 = vmatpush.bf16.msrb.mxu1 %v1671_v4  ;;  %v1579_v3 = vor.u32 %v1895_v2, %v1578_v1  ;;  %v1894_v4 = vld [vmem:[#allocation11 + $0x14] sm:$0xf] }
  0xbb   :  { %925 = vmatpush.bf16.msra.mxu2 %v1603_v32  ;;  %951 = vmatpush.bf16.msrb.mxu0 %v1607_v36  ;;  %v1951_v32 = vld [vmem:[#allocation13 + $0xd4] sm:$0xf0]  ;;  %v1937_v36 = vld [vmem:[#allocation13 + $0x64] sm:$0xf0] }
  0xbe   :  { %939 = vmatpush.bf16.msra.mxu3 %v1659_v26  ;;  %965 = vmatpush.bf16.msrb.mxu1 %v1663_v28  ;;  %v1938_v26 = vld [vmem:[#allocation13 + $0x74] sm:$0xf] }
  0xbf   :  { %926 = vmatpush.bf16.msra.mxu2 %v1595_v44  ;;  %952 = vmatpush.bf16.msrb.mxu0 %v1599_v46  ;;  %v1759_v30 = vor.u32 %v1938_v26, %v1756_v27  ;;  %v1807_v44 = vor.u32 %v1950_v33, %v1804_v34  ;;  %v1935_v46 = vld [vmem:[#allocation13 + $0x54] sm:$0xf0]  ;;  %v1780_v26 = vld [vmem:[#allocation13 + $0xa8] sm:$0xf0]  ;;  %v1770_v34 = vld [vmem:[#allocation13 + $0x90] sm:$0xf] }
  0xc0   :  { %v1739_v51 = vor.u32 %v1935_v46, %v1738_v45  ;;  %v1783_v27 = vor.u32 %v1944_v25, %v1780_v26  ;;  %v1762_v46 = vld [vmem:[#allocation13 + $0x80] sm:$0xf] }
  0xc2   :  { %940 = vmatpush.bf16.msra.mxu3 %v1651_v37  ;;  %966 = vmatpush.bf16.msrb.mxu1 %v1655_v40  ;;  %v1747_v37 = vor.u32 %v1937_v36, %v1746_v35  ;;  %v1803_v40 = vor.u32 %v1951_v32, %v1802_v31  ;;  %v1724_v32 = vld [vmem:[#allocation13 + $0x38] sm:$0xf0]  ;;  %v1943_v35 = vld [vmem:[#allocation13 + $0x94] sm:$0xf0] }
  0xc3   :  { %927 = vmatpush.bf16.msra.mxu2 %v1587_v56  ;;  %953 = vmatpush.bf16.msrb.mxu0 %v1591_v58  ;;  %v1771_v36 = vor.u32 %v1943_v35, %v1770_v34 }
  0xc6   :  { %941 = vmatpush.bf16.msra.mxu3 %v1643_v49  ;;  %967 = vmatpush.bf16.msrb.mxu1 %v1647_v52  ;;  %v1796_v49 = vld [vmem:[#allocation13 + $0xc8] sm:$0xf0]  ;;  %v1743_v52 = vor.u32 %v1934_v47, %v1740_v50  ;;  %v1941_v47 = vld [vmem:[#allocation13 + $0x84] sm:$0xf0] }
  0xc7   :  { %928 = vmatpush.bf16.msra.mxu2 %v1579_v3  ;;  %v1799_v56 = vor.u32 %v1948_v48, %v1796_v49  ;;  %v1940_v48 = vld [vmem:[#allocation13 + $0x84] sm:$0xf]  ;;  %v1763_v49 = vor.u32 %v1941_v47, %v1762_v46  ;;  %v1764_v50 = vld [vmem:[#allocation13 + $0x88] sm:$0xf0] }
  0xca   :  { %942 = vmatpush.bf16.msra.mxu3 %v1635_v62  ;;  %968 = vmatpush.bf16.msrb.mxu1 %v1639_v0 }
 0x129   :  { %v449_v6 = vpop.f32.mrf.mxu0 }
 0x12a   :  { %v450_v7 = vadd.f32 %v449_v6, %v251_v5  ;;  %v462_v8 = vpop.f32.mrf.mxu1  ;;  %v1580_v5 = vld [vmem:[#allocation11 + $0x18] sm:$0xf0] }
 0x12b   :  { %v1583_v6 = vor.u32 %v1894_v4, %v1580_v5 }
 0x12c   :  { %v463_v9 = vadd.f32 %v462_v8, %v450_v7  ;;  %v1570_v7 = vld [vmem:[#allocation11] sm:$0xf]  ;;  %v1893_v8 = vld [vmem:[#allocation11 + $0x4] sm:$0xf0] }
 0x12d   :  { %954 = vmatpush.bf16.msrb.mxu0 %v1583_v6 }
 0x12e   :  { %v467_v11 = vmax.f32 %v463_v9, 0.0  ;;  %v1892_v9 = vld [vmem:[#allocation11 + $0x4] sm:$0xf] }
 0x12f   :  { %v423_v12 = vpop.f32.mrf.mxu2 }
 0x130   :  { %v469_v13 = vpack.c.bf16 %v467_v11, %v467_v11  ;;  %v424_v14 = vadd.f32 %v423_v12, %v250_v10  ;;  %v436_v15 = vpop.f32.mrf.mxu3  ;;  %v1571_v10 = vor.u32 %v1893_v8, %v1570_v7  ;;  %v1572_v11 = vld [vmem:[#allocation11 + $0x8] sm:$0xf0] }
 0x131   :  { %v451_v16 = vpop.f32.mrf.mxu0  ;;  %v1575_v12 = vor.u32 %v1892_v9, %v1572_v11  ;;  %v1947_v11 = vld [vmem:[#allocation13 + $0xb4] sm:$0xf0] }
 0x132   :  { %v437_v17 = vadd.f32 %v436_v15, %v424_v14  ;;  %v464_v18 = vpop.f32.mrf.mxu1  ;;  %689 = vmatmul.bf16.vlgmr.msrb.gmra.mxu3 %v469_v13  ;;  %715 = vmatmul.bf16.vlgmr.msra.gmra.mxu1 %v469_v13  ;;  %v1818_v13 = vld [vmem:[#allocation13 + $0xf0] sm:$0xf]  ;;  %v1955_v14 = vld [vmem:[#allocation13 + $0xf4] sm:$0xf0]  ;;  %v1954_v15 = vld [vmem:[#allocation13 + $0xf4] sm:$0xf] }
 0x133   :  { %929 = vmatpush.bf16.msra.mxu2 %v1571_v10  ;;  %955 = vmatpush.bf16.msrb.mxu0 %v1575_v12  ;;  %v1819_v16 = vor.u32 %v1955_v14, %v1818_v13  ;;  %v1810_v18 = vld [vmem:[#allocation13 + $0xe0] sm:$0xf]  ;;  %v1786_v10 = vld [vmem:[#allocation13 + $0xb0] sm:$0xf]  ;;  %v1946_v12 = vld [vmem:[#allocation13 + $0xb4] sm:$0xf] }
 0x134   :  { %v466_v19 = vmax.f32 %v437_v17, 0.0  ;;  %v1820_v17 = vld [vmem:[#allocation13 + $0xf8] sm:$0xf0]  ;;  %v1787_v13 = vor.u32 %v1947_v11, %v1786_v10 }
 0x135   :  { %1189 = vmatpush.bf16.msrb.mxu3 %v1819_v16  ;;  %v1788_v14 = vld [vmem:[#allocation13 + $0xb8] sm:$0xf0]  ;;  %v1730_v16 = vld [vmem:[#allocation13 + $0x40] sm:$0xf] }
 0x136   :  { %v468_v20 = vpack.c.bf16 %v466_v19, %v466_v19  ;;  %v1953_v19 = vld [vmem:[#allocation13 + $0xe4] sm:$0xf0] }
 0x137   :  { %v425_v21 = vpop.f32.mrf.mxu2  ;;  %v1811_v24 = vor.u32 %v1953_v19, %v1810_v18  ;;  %v1932_v18 = vld [vmem:[#allocation13 + $0x44] sm:$0xf] }
 0x138   :  { %v438_v22 = vpop.f32.mrf.mxu3  ;;  %676 = vmatmul.bf16.vlgmr.msrb.gmra.mxu2 %v468_v20  ;;  %702 = vmatmul.bf16.vlgmr.msra.gmra.mxu0 %v468_v20  ;;  %v1823_v20 = vor.u32 %v1954_v15, %v1820_v17  ;;  %v1952_v21 = vld [vmem:[#allocation13 + $0xe4] sm:$0xf]  ;;  %v1791_v15 = vor.u32 %v1946_v12, %v1788_v14  ;;  %v1933_v17 = vld [vmem:[#allocation13 + $0x44] sm:$0xf0] }
 0x139   :  { %v1812_v22 = vld [vmem:[#allocation13 + $0xe8] sm:$0xf0]  ;;  %1176 = vmatpush.bf16.msrb.mxu2 %v1755_v29  ;;  %1202 = vmatpush.bf16.msra.mxu0 %v1759_v30  ;;  %v1731_v19 = vor.u32 %v1933_v17, %v1730_v16  ;;  %v1931_v29 = vld [vmem:[#allocation13 + $0x34] sm:$0xf0]  ;;  %v1930_v30 = vld [vmem:[#allocation13 + $0x34] sm:$0xf] }
 0x13a   :  { %1215 = vmatpush.bf16.msra.mxu1 %v1823_v20  ;;  %v1815_v28 = vor.u32 %v1952_v21, %v1812_v22  ;;  %1190 = vmatpush.bf16.msrb.mxu3 %v1811_v24  ;;  %v1732_v20 = vld [vmem:[#allocation13 + $0x48] sm:$0xf0]  ;;  %v1778_v21 = vld [vmem:[#allocation13 + $0xa0] sm:$0xf]  ;;  %v1945_v22 = vld [vmem:[#allocation13 + $0xa4] sm:$0xf0]  ;;  %v1727_v33 = vor.u32 %v1930_v30, %v1724_v32 }
 0x13b   :  { %v1735_v23 = vor.u32 %v1932_v18, %v1732_v20  ;;  %v1779_v24 = vor.u32 %v1945_v22, %v1778_v21  ;;  %v2179_v20 = vmov 0   ;;  %v1010_v22 = vld [vmem:[%s2320_s10] sm:$0x3]  ;;  %s2180_s10 = smov [#allocation14]  }
 0x13c   :  { %1967 = vset.pattern.permute.xlu0 %v2179_v20 }
 0x13d   :  { %1177 = vmatpush.bf16.msrb.mxu2 %v1747_v37  ;;  %1203 = vmatpush.bf16.msra.mxu0 %v1751_v41  ;;  %v1942_v37 = vld [vmem:[#allocation13 + $0x94] sm:$0xf]  ;;  %v1929_v41 = vld [vmem:[#allocation13 + $0x24] sm:$0xf0] }
 0x13e   :  { %1216 = vmatpush.bf16.msra.mxu1 %v1815_v28  ;;  %1191 = vmatpush.bf16.msrb.mxu3 %v1803_v40  ;;  %v1722_v28 = vld [vmem:[#allocation13 + $0x30] sm:$0xf]  ;;  %v1775_v39 = vor.u32 %v1942_v37, %v1772_v38  ;;  %v1714_v40 = vld [vmem:[#allocation13 + $0x20] sm:$0xf] }
 0x13f   :  { %v1723_v31 = vor.u32 %v1931_v29, %v1722_v28  ;;  %v1715_v43 = vor.u32 %v1929_v41, %v1714_v40  ;;  %v1012_v29 = vperm.slane %v1010_v22, 0 }
 0x141   :  { %1178 = vmatpush.bf16.msrb.mxu2 %v1739_v51  ;;  %1204 = vmatpush.bf16.msra.mxu0 %v1743_v52  ;;  %v1767_v51 = vor.u32 %v1940_v48, %v1764_v50  ;;  %v1706_v52 = vld [vmem:[#allocation13 + $0x10] sm:$0xf] }
 0x142   :  { %1217 = vmatpush.bf16.msra.mxu1 %v1807_v44  ;;  %1192 = vmatpush.bf16.msrb.mxu3 %v1795_v55  ;;  %v1716_v44 = vld [vmem:[#allocation13 + $0x28] sm:$0xf0]  ;;  %v1926_v55 = vld [vmem:[#allocation13 + $0x14] sm:$0xf] }
 0x143   :  { %v1719_v45 = vor.u32 %v1928_v42, %v1716_v44 }
 0x145   :  { %1179 = vmatpush.bf16.msrb.mxu2 %v1731_v19  ;;  %1205 = vmatpush.bf16.msra.mxu0 %v1735_v23  ;;  %v1233_v19 = vld [vmem:[%s2322_s12] sm:$0xff]  ;;  %v1013_v23 = vperm.slane %v1010_v22, 1 }
 0x146   :  { %1218 = vmatpush.bf16.msra.mxu1 %v1799_v56  ;;  %1193 = vmatpush.bf16.msrb.mxu3 %v1787_v13  ;;  %v1708_v56 = vld [vmem:[#allocation13 + $0x18] sm:$0xf0] }
 0x147   :  { %1236 = vperm.xlu0 %1967, %v1233_v19  }
 0x149   :  { %1180 = vmatpush.bf16.msrb.mxu2 %v1723_v31  ;;  %1206 = vmatpush.bf16.msra.mxu0 %v1727_v33  ;;  %v1230_v31 = vld [vmem:[%s2321_s11] sm:$0xff]  ;;  %s1279_s11 = sshll.u32 %s2180_s10, 4  ;;  %s1280_s11 = int_to_ptr.vmem [resolvable:$true] %s1279_s11 }
 0x14a   :  { %1219 = vmatpush.bf16.msra.mxu1 %v1791_v15  ;;  %1194 = vmatpush.bf16.msrb.mxu3 %v1779_v24  ;;  %v1241_v37 = vunpack.c.h.b16 %v1230_v31 }
 0x14c   :  { %v1243_v40 = vpack.c.b16 %v1241_v37, %v1241_v37 }
 0x14d   :  { %1181 = vmatpush.bf16.msrb.mxu2 %v1715_v43  ;;  %1207 = vmatpush.bf16.msra.mxu0 %v1719_v45  ;;  %v1240_v43 = vunpack.c.l.b16 %v1230_v31 }
 0x14e   :  { %1220 = vmatpush.bf16.msra.mxu1 %v1783_v27  ;;  %1195 = vmatpush.bf16.msrb.mxu3 %v1771_v36 }
 0x14f   :  { %v1242_v44 = vpack.c.b16 %v1240_v43, %v1240_v43 }
 0x152   :  { %1221 = vmatpush.bf16.msra.mxu1 %v1775_v39  ;;  %1196 = vmatpush.bf16.msrb.mxu3 %v1763_v49 }
 0x156   :  { %1222 = vmatpush.bf16.msra.mxu1 %v1767_v51 }
 0x1af   :  { %v716_v53 = vpop.f32.mrf.mxu1 }
 0x1b5   :  { %v690_v58 = vpop.f32.mrf.mxu3  ;;  %v703_v59 = vpop.f32.mrf.mxu0 }
 0x1b6   :  { %v704_v60 = vadd.f32 %v703_v59, %v505_v57  ;;  %v1711_v57 = vor.u32 %v1926_v55, %v1708_v56  ;;  %v1925_v59 = vld [vmem:[#allocation13 + $0x4] sm:$0xf0] }
 0x1b7   :  { %v718_v61 = vpop.f32.mrf.mxu1 }
 0x1b8   :  { %v717_v62 = vadd.f32 %v716_v53, %v704_v60  ;;  %v1927_v53 = vld [vmem:[#allocation13 + $0x14] sm:$0xf0]  ;;  %1208 = vmatpush.bf16.msra.mxu0 %v1711_v57  ;;  %v1924_v60 = vld [vmem:[#allocation13 + $0x4] sm:$0xf] }
 0x1b9   :  { %v1707_v54 = vor.u32 %v1927_v53, %v1706_v52  ;;  %v1237_v46 = vpop.permute.xlu0 %1236 }
 0x1ba   :  { %v721_v0 = vmax.f32 %v717_v62, 0.0  ;;  %v1700_v62 = vld [vmem:[#allocation13 + $0x8] sm:$0xf0] }
 0x1bb   :  { %v677_v1 = vpop.f32.mrf.mxu2  ;;  %1182 = vmatpush.bf16.msrb.mxu2 %v1707_v54 }
 0x1bc   :  { %v723_v2 = vpack.c.bf16 %v721_v0, %v721_v0  ;;  %v678_v3 = vadd.f32 %v677_v1, %v504_v63  ;;  %v1703_v63 = vor.u32 %v1924_v60, %v1700_v62  ;;  %v756_v1 = vld [vmem:[%s2318_s8] sm:$0x3] }
 0x1bd   :  { %v692_v4 = vpop.f32.mrf.mxu3  ;;  %v705_v5 = vpop.f32.mrf.mxu0 }
 0x1be   :  { %v691_v6 = vadd.f32 %v690_v58, %v678_v3  ;;  %943 = vmatmul.bf16.vlgmr.msra.gmra.mxu3 %v723_v2  ;;  %969 = vmatmul.bf16.vlgmr.msrb.gmra.mxu1 %v723_v2  ;;  %v1698_v58 = vld [vmem:[#allocation13] sm:$0xf]  ;;  %v759_v2 = vperm.slane %v756_v1, 1 }
 0x1bf   :  { %v1699_v61 = vor.u32 %v1925_v59, %v1698_v58  ;;  %1209 = vmatpush.bf16.msra.mxu0 %v1703_v63 }
 0x1c0   :  { %v720_v7 = vmax.f32 %v691_v6, 0.0 }
 0x1c1   :  { %1183 = vmatpush.bf16.msrb.mxu2 %v1699_v61 }
 0x1c2   :  { %v722_v8 = vpack.c.bf16 %v720_v7, %v720_v7 }
 0x1c3   :  { %v679_v9 = vpop.f32.mrf.mxu2 }
 0x1c4   :  { %930 = vmatmul.bf16.vlgmr.msra.gmra.mxu2 %v722_v8  ;;  %956 = vmatmul.bf16.vlgmr.msrb.gmra.mxu0 %v722_v8  ;;  %v758_v8 = vperm.slane %v756_v1, 0 }
 0x23b   :  { %v970_v0 = vpop.f32.mrf.mxu1 }
 0x241   :  { %v944_v3 = vpop.f32.mrf.mxu3  ;;  %v957_v4 = vpop.f32.mrf.mxu0 }
 0x242   :  { %v958_v5 = vadd.f32 %v957_v4, %v759_v2 }
 0x243   :  { %v972_v6 = vpop.f32.mrf.mxu1 }
 0x244   :  { %v971_v7 = vadd.f32 %v970_v0, %v958_v5 }
 0x246   :  { %v975_v9 = vmax.f32 %v971_v7, 0.0 }
 0x247   :  { %v931_v10 = vpop.f32.mrf.mxu2 }
 0x248   :  { %v977_v11 = vpack.c.bf16 %v975_v9, %v975_v9  ;;  %v932_v12 = vadd.f32 %v931_v10, %v758_v8 }
 0x249   :  { %v946_v13 = vpop.f32.mrf.mxu3  ;;  %v959_v14 = vpop.f32.mrf.mxu0 }
 0x24a   :  { %v945_v15 = vadd.f32 %v944_v3, %v932_v12  ;;  %1197 = vmatmul.bf16.vlgmr.msrb.gmra.mxu3 %v977_v11  ;;  %1223 = vmatmul.bf16.vlgmr.msra.gmra.mxu1 %v977_v11 }
 0x24c   :  { %v974_v16 = vmax.f32 %v945_v15, 0.0 }
 0x24e   :  { %v976_v17 = vpack.c.bf16 %v974_v16, %v974_v16 }
 0x24f   :  { %v933_v18 = vpop.f32.mrf.mxu2 }
 0x250   :  { %1184 = vmatmul.bf16.vlgmr.msrb.gmra.mxu2 %v976_v17  ;;  %1210 = vmatmul.bf16.vlgmr.msra.gmra.mxu0 %v976_v17 }
 0x2c7   :  { %v1224_v21 = vpop.f32.mrf.mxu1 }
 0x2cd   :  { %v1198_v24 = vpop.f32.mrf.mxu3  ;;  %v1211_v25 = vpop.f32.mrf.mxu0 }
 0x2ce   :  { %v1212_v26 = vadd.f32 %v1211_v25, %v1013_v23 }
 0x2cf   :  { %v1226_v27 = vpop.f32.mrf.mxu1 }
 0x2d0   :  { %v1225_v28 = vadd.f32 %v1224_v21, %v1212_v26 }
 0x2d2   :  { %v1229_v30 = vmax.f32 %v1225_v28, 0.0 }
 0x2d3   :  { %v1185_v32 = vpop.f32.mrf.mxu2 }
 0x2d4   :  { %v1232_v33 = vpack.c.bf16 %v1229_v30, %v1229_v30  ;;  %v1186_v34 = vadd.f32 %v1185_v32, %v1012_v29 }
 0x2d5   :  { %v1200_v35 = vpop.f32.mrf.mxu3  ;;  %v1213_v36 = vpop.f32.mrf.mxu0 }
 0x2d6   :  { %v1199_v38 = vadd.f32 %v1198_v24, %v1186_v34  ;;  %1266 = vmatpush.bf16.xpose.msra.mxu3 %v1232_v33 }
 0x2d8   :  { %v1228_v39 = vmax.f32 %v1199_v38, 0.0 }
 0x2da   :  { %v1231_v41 = vpack.c.bf16 %v1228_v39, %v1228_v39 }
 0x2db   :  { %v1187_v42 = vpop.f32.mrf.mxu2 }
 0x2dc   :  { %1253 = vmatpush.bf16.xpose.msra.mxu2 %v1231_v41 }
 0x2dd   :  { %1267 = vmatmul.bf16.vlgmr.msra.gmra.mxu3 %v1243_v40 }
 0x2e3   :  { %1254 = vmatmul.bf16.vlgmr.msra.gmra.mxu2 %v1242_v44 }
 0x360   :  { %v1268_v45 = vpop.f32.mrf.mxu3 }
 0x366   :  { %v1255_v47 = vpop.f32.mrf.mxu2 }
 0x367   :  { %v1256_v48 = vadd.f32 %v1255_v47, %v1237_v46 }
 0x368   :  { %v1270_v49 = vpop.f32.mrf.mxu3 }
 0x369   :  { %v1269_v50 = vadd.f32 %v1268_v45, %v1256_v48 }
 0x36b   :  { %1273 = vst.msk [vmem:[#allocation14] sm:$0xff] %vm1272_vm1, %v1269_v50 }
 0x36c   :  { %1284 = dma.vmem_to_hbm [thread:$0]  %s1280_s11, 128, %s1282_s28, [#allocation4]  }
 0x36e   :  { %v1257_v51 = vpop.f32.mrf.mxu2 }
 0x36f   :  { %2168 = dma.done.wait [#allocation4], 128  }
 0x370   :  { %2169 = vsyncadd [#allocation4], 4294967168 }
 0x371   :  { %1289 = vsyncpa [#allocation3], 1 }
 0x372   :  { %1290 = vsyncpa [#allocation6], 1 }
 0x373   :  { %1291 = vsyncpa [#allocation9], 1 }
 0x374   :  { %1292 = vsyncpa [#allocation12], 1 }
 0x375   :  { %1293 = vsyncpa [#allocation4], 1 }

</bundles_post_ra>
